<compile_context>
chip_gen: v6e
topology: v6e:2x2x1
jax: 0.10.0
libtpu: 0.0.40
codegen_flags: <defaults>
</compile_context>

<pallas_src>
import math

import jax
import jax.numpy as jnp
from jax import lax
from jax.experimental import pallas as pl
from jax.experimental.pallas import tpu as pltpu


_MAX_BATCH_BLOCK = 16  # keeps the h block tiny (<~32 KB) on every generation


def _pick_batch_block(B):
    """Chip-aware batch blocking.

    v5e / v6e have a single TensorCore per chip, so a batch grid axis is a pure
    sequential loop: fold the whole batch into one grid step.  v7x has two
    TensorCores per chip, so keep >= 2 grid steps (marked "parallel") to use both.
    """
    try:
        kind = jax.devices()[0].device_kind.lower()
    except Exception:  # pragma: no cover - defensive only
        kind = ""
    if "v7" in kind and B >= 2:
        target = pl.cdiv(B, 2)  # two grid steps -> one per TensorCore
    else:
        target = B              # single TC: one grid step for the whole batch
    bt = max(1, min(target, _MAX_BATCH_BLOCK))
    while B % bt != 0:          # keep blocks exact (B is small, loop is cheap)
        bt -= 1
    return bt


def _mha_kernel(n_heads, key_dim, embed_dim, n_query, graph_size, norm_factor):
    def kernel(q_ref, h_ref, w_ref, o_ref):
        bt = q_ref.shape[0]
        input_dim = q_ref.shape[2]
        nq_rows = bt * n_query
        h_e = n_heads * embed_dim     # width of the fused VO column block (128 here)
        h_k = n_heads * key_dim       # width of the Q / K column blocks (32 here)

        # (Bt, n, d) -> (Bt*n, d) is layout-free: n is a multiple of the f32 sublane tile.
        qf = q_ref[...].reshape(nq_rows, input_dim) * norm_factor  # fold scale into Q rows
        hf = h_ref[...].reshape(bt * graph_size, input_dim)
        x = jnp.concatenate([qf, hf], axis=0)       # (Bt*(nq+gs), input_dim)

        # One fused projection: columns are [ W_val@W_out | W_query | W_key ].
        proj = jnp.dot(x, w_ref[...], preferred_element_type=jnp.float32)

        # vreg-aligned lane slices: VO at lane 0 (width 128), Q at lane 128.
        VOP = proj[nq_rows:, :h_e]                  # (Bt*gs, H*E)   values (W_out folded in)
        QP = proj[:nq_rows, h_e:h_e + h_k]          # (Bt*nq, H*Kd)  pre-scaled queries
        KP = proj[nq_rows:, h_e + h_k:]             # (Bt*gs, H*Kd)  keys

        for b in range(bt):                         # static, unrolled at trace time
            Qb = QP[b * n_query:(b + 1) * n_query, :]
            Kb = KP[b * graph_size:(b + 1) * graph_size, :]
            Vb = VOP[b * graph_size:(b + 1) * graph_size, :]
            acc = jnp.zeros((n_query, embed_dim), jnp.float32)
            for hh in range(n_heads):               # static, unrolled at trace time
                Qh = Qb[:, hh * key_dim:(hh + 1) * key_dim]     # (nq, Kd)
                Kh = Kb[:, hh * key_dim:(hh + 1) * key_dim]     # (gs, Kd)
                # Contract on key_dim directly (no explicit K transpose).
                s = lax.dot_general(
                    Qh, Kh,
                    dimension_numbers=(((1,), (1,)), ((), ())),
                    preferred_element_type=jnp.float32)         # (nq, gs)

                s = s - jnp.max(s, axis=-1, keepdims=True)
                e = jnp.exp(s)
                denom = jnp.sum(e, axis=-1, keepdims=True)
                inv = pl.reciprocal(denom, approx=True)         # EUP slot (VALU stays free)
                inv = inv * (2.0 - denom * inv)                 # one Newton refinement
                attn = e * inv

                # W_out already folded into the values: per-head output is embed_dim wide.
                acc = acc + jnp.dot(
                    attn, Vb[:, hh * embed_dim:(hh + 1) * embed_dim],
                    preferred_element_type=jnp.float32)
            o_ref[b] = acc

    return kernel


def multi_head_attention(q, h, W_query, W_key, W_val, W_out):
    B, n_query, input_dim = q.shape
    _, graph_size, _ = h.shape
    n_heads, _, key_dim = W_query.shape
    embed_dim = W_out.shape[-1]
    norm_factor = 1.0 / math.sqrt(key_dim)

    # Fold W_out into W_val (layout/constant work, done once per call in the wrapper):
    #   sum_h (attn_h @ (h W_val[h])) @ W_out[h] == sum_h attn_h @ (h (W_val[h] @ W_out[h]))
    w_vo = jnp.einsum("hiv,hve->hie", W_val, W_out)                 # (H, input_dim, E)
    wvo_p = jnp.transpose(w_vo, (1, 0, 2)).reshape(input_dim, n_heads * embed_dim)
    wq_p = jnp.transpose(W_query, (1, 0, 2)).reshape(input_dim, n_heads * key_dim)
    wk_p = jnp.transpose(W_key, (1, 0, 2)).reshape(input_dim, n_heads * key_dim)
    # Fused projection weight; VO block first so its 128-lane slice is vreg-aligned.
    w_fused = jnp.concatenate([wvo_p, wq_p, wk_p], axis=1)          # (input_dim, H*E + 2*H*Kd)

    bt = _pick_batch_block(B)
    grid = (B // bt,)

    return pl.pallas_call(
        _mha_kernel(n_heads, key_dim, embed_dim, n_query, graph_size, norm_factor),
        out_shape=jax.ShapeDtypeStruct((B, n_query, embed_dim), jnp.float32),
        grid_spec=pltpu.PrefetchScalarGridSpec(
            num_scalar_prefetch=0,
            grid=grid,
            in_specs=[
                pl.BlockSpec((bt, n_query, input_dim), lambda i: (i, 0, 0)),
                pl.BlockSpec((bt, graph_size, input_dim), lambda i: (i, 0, 0)),
                # Whole-array fused weight: DMAed once, VMEM-resident across the grid.
                pl.BlockSpec(w_fused.shape, lambda i: (0, 0)),
            ],
            out_specs=pl.BlockSpec((bt, n_query, embed_dim), lambda i: (i, 0, 0)),
        ),
        compiler_params=pltpu.CompilerParams(
            dimension_semantics=("parallel",)  # v7x: the two TCs each take a batch block
        ),
    )(q, h, w_fused)


def _reference(q, h, W_query, W_key, W_val, W_out):
    """Pure-JAX replica of the PyTorch forward (mask=None)."""
    n_heads, input_dim, key_dim = W_query.shape
    norm = 1.0 / math.sqrt(key_dim)
    Q = jnp.einsum("bqd,hdk->hbqk", q, W_query)
    K = jnp.einsum("bgd,hdk->hbgk", h, W_key)
    V = jnp.einsum("bgd,hdv->hbgv", h, W_val)
    compat = norm * jnp.einsum("hbqk,hbgk->hbqg", Q, K)
    attn = jax.nn.softmax(compat, axis=-1)
    heads = jnp.einsum("hbqg,hbgv->hbqv", attn, V)
    out = jnp.einsum("hbqv,hve->bqe", heads, W_out)
    return out


if __name__ == "__main__":
    # Module hyperparameters (small, consistent with the forward).
    n_heads = 4
    input_dim = 32
    embed_dim = 32
    val_dim = embed_dim // n_heads   # 8
    key_dim = val_dim                # 8

    batch_size = 2
    n_query = 8
    graph_size = 16

    key = jax.random.PRNGKey(0)
    k_q, k_h, k_wq, k_wk, k_wv, k_wo = jax.random.split(key, 6)

    # Deterministic init mirroring init_parameters(): U(-stdv, stdv), stdv = 1/sqrt(last dim)
    def uniform_init(k, shape):
        stdv = 1.0 / math.sqrt(shape[-1])
        return jax.random.uniform(k, shape, jnp.float32, -stdv, stdv)

    W_query = uniform_init(k_wq, (n_heads, input_dim, key_dim))
    W_key = uniform_init(k_wk, (n_heads, input_dim, key_dim))
    W_val = uniform_init(k_wv, (n_heads, input_dim, val_dim))
    W_out = uniform_init(k_wo, (n_heads, val_dim, embed_dim))

    q = jax.random.normal(k_q, (batch_size, n_query, input_dim), jnp.float32)
    h = jax.random.normal(k_h, (batch_size, graph_size, input_dim), jnp.float32)

    out = multi_head_attention(q, h, W_query, W_key, W_val, W_out)
    out = jax.block_until_ready(out)

    ref = _reference(q, h, W_query, W_key, W_val, W_out)
    assert out.shape == (batch_size, n_query, embed_dim)
    assert jnp.allclose(out, ref, atol=1e-4, rtol=1e-4), "mismatch vs JAX reference"

    print("KERNEL_OK")
</pallas_src>

<mosaic_0001>
module attributes {stable_mosaic.version = 11 : i64} {
  func.func @kernel(%arg0: i32, %arg1: memref<2x8x32xf32, #tpu.memory_space<vmem>>, %arg2: memref<2x16x32xf32, #tpu.memory_space<vmem>>, %arg3: memref<32x192xf32, #tpu.memory_space<vmem>>, %arg4: memref<2x8x32xf32, #tpu.memory_space<vmem>>) attributes {dimension_semantics = [#tpu.dimension_semantics<parallel>], iteration_bounds = array<i64: 1>, scalar_prefetch = 0 : i64, scratch_operands = 0 : i64, tpu.core_type = #tpu.core_type<tc>, window_params = [{transform_indices = @transform_0, window_bounds = array<i64: 2, 8, 32>}, {transform_indices = @transform_1, window_bounds = array<i64: 2, 16, 32>}, {pipeline_mode = #tpu.pipeline_mode<synchronous>, transform_indices = @transform_2, window_bounds = array<i64: 32, 192>}, {transform_indices = @transform_3, window_bounds = array<i64: 2, 8, 32>}]} {
    %c0 = arith.constant 0 : index
    %c0_0 = arith.constant 0 : index
    %c0_1 = arith.constant 0 : index
    %0 = vector.load %arg1[%c0, %c0_0, %c0_1] : memref<2x8x32xf32, #tpu.memory_space<vmem>>, vector<2x8x32xf32>
    %1 = vector.shape_cast %0 : vector<2x8x32xf32> to vector<16x32xf32>
    %cst = arith.constant 0.353553385 : f32
    %2 = vector.broadcast %cst : f32 to vector<16x32xf32>
    %3 = arith.mulf %1, %2 : vector<16x32xf32>
    %c0_2 = arith.constant 0 : index
    %c0_3 = arith.constant 0 : index
    %c0_4 = arith.constant 0 : index
    %4 = vector.load %arg2[%c0_2, %c0_3, %c0_4] : memref<2x16x32xf32, #tpu.memory_space<vmem>>, vector<2x16x32xf32>
    %5 = vector.shape_cast %4 : vector<2x16x32xf32> to vector<32x32xf32>
    %6 = tpu.concatenate %3, %5 in 0 : vector<16x32xf32>, vector<32x32xf32> -> vector<48x32xf32>
    %c0_5 = arith.constant 0 : index
    %c0_6 = arith.constant 0 : index
    %7 = vector.load %arg3[%c0_5, %c0_6] : memref<32x192xf32, #tpu.memory_space<vmem>>, vector<32x192xf32>
    %cst_7 = arith.constant dense<0.000000e+00> : vector<48x192xf32>
    %8 = tpu.matmul %6, %7, %cst_7 {dimension_numbers = #tpu.dot_dimension_numbers<[1], [0], [0], [1], [0, 0, 1, 1], [], []>} : vector<48x32xf32>, vector<32x192xf32>, vector<48x192xf32> -> vector<48x192xf32>
    %9 = vector.extract_strided_slice %8 {offsets = [16, 0], sizes = [32, 128], strides = [1, 1]} : vector<48x192xf32> to vector<32x128xf32>
    %10 = vector.extract_strided_slice %8 {offsets = [0, 128], sizes = [16, 32], strides = [1, 1]} : vector<48x192xf32> to vector<16x32xf32>
    %11 = vector.extract_strided_slice %8 {offsets = [16, 160], sizes = [32, 32], strides = [1, 1]} : vector<48x192xf32> to vector<32x32xf32>
    %12 = vector.extract_strided_slice %10 {offsets = [0, 0], sizes = [8, 32], strides = [1, 1]} : vector<16x32xf32> to vector<8x32xf32>
    %13 = vector.extract_strided_slice %11 {offsets = [0, 0], sizes = [16, 32], strides = [1, 1]} : vector<32x32xf32> to vector<16x32xf32>
    %14 = vector.extract_strided_slice %9 {offsets = [0, 0], sizes = [16, 128], strides = [1, 1]} : vector<32x128xf32> to vector<16x128xf32>
    %cst_8 = arith.constant 0.000000e+00 : f32
    %15 = vector.broadcast %cst_8 : f32 to vector<8x32xf32>
    %16 = vector.extract_strided_slice %12 {offsets = [0, 0], sizes = [8, 8], strides = [1, 1]} : vector<8x32xf32> to vector<8x8xf32>
    %17 = vector.extract_strided_slice %13 {offsets = [0, 0], sizes = [16, 8], strides = [1, 1]} : vector<16x32xf32> to vector<16x8xf32>
    %cst_9 = arith.constant dense<0.000000e+00> : vector<8x16xf32>
    %18 = tpu.matmul %16, %17, %cst_9 {dimension_numbers = #tpu.dot_dimension_numbers<[1], [1], [0], [0], [0, 0, 1, 0], [], []>} : vector<8x8xf32>, vector<16x8xf32>, vector<8x16xf32> -> vector<8x16xf32>
    %cst_10 = arith.constant dense<0xFF800000> : vector<8xf32>
    %19 = vector.multi_reduction <maximumf>, %18, %cst_10 [1] : vector<8x16xf32> to vector<8xf32>
    %20 = vector.shape_cast %19 : vector<8xf32> to vector<8x1xf32>
    %21 = vector.broadcast %20 : vector<8x1xf32> to vector<8x16xf32>
    %22 = arith.subf %18, %21 : vector<8x16xf32>
    %23 = math.exp %22 : vector<8x16xf32>
    %cst_11 = arith.constant dense<0.000000e+00> : vector<8xf32>
    %24 = vector.multi_reduction <add>, %23, %cst_11 [1] : vector<8x16xf32> to vector<8xf32>
    %25 = vector.shape_cast %24 : vector<8xf32> to vector<8x1xf32>
    %26 = tpu.reciprocal %25 {approx = true} : vector<8x1xf32> -> vector<8x1xf32>
    %27 = arith.mulf %25, %26 : vector<8x1xf32>
    %cst_12 = arith.constant 2.000000e+00 : f32
    %28 = vector.broadcast %cst_12 : f32 to vector<8x1xf32>
    %29 = arith.subf %28, %27 : vector<8x1xf32>
    %30 = arith.mulf %26, %29 : vector<8x1xf32>
    %31 = vector.broadcast %30 : vector<8x1xf32> to vector<8x16xf32>
    %32 = arith.mulf %23, %31 : vector<8x16xf32>
    %33 = vector.extract_strided_slice %14 {offsets = [0, 0], sizes = [16, 32], strides = [1, 1]} : vector<16x128xf32> to vector<16x32xf32>
    %cst_13 = arith.constant dense<0.000000e+00> : vector<8x32xf32>
    %34 = tpu.matmul %32, %33, %cst_13 {dimension_numbers = #tpu.dot_dimension_numbers<[1], [0], [0], [1], [0, 0, 1, 1], [], []>} : vector<8x16xf32>, vector<16x32xf32>, vector<8x32xf32> -> vector<8x32xf32>
    %35 = arith.addf %15, %34 : vector<8x32xf32>
    %36 = vector.extract_strided_slice %12 {offsets = [0, 8], sizes = [8, 8], strides = [1, 1]} : vector<8x32xf32> to vector<8x8xf32>
    %37 = vector.extract_strided_slice %13 {offsets = [0, 8], sizes = [16, 8], strides = [1, 1]} : vector<16x32xf32> to vector<16x8xf32>
    %cst_14 = arith.constant dense<0.000000e+00> : vector<8x16xf32>
    %38 = tpu.matmul %36, %37, %cst_14 {dimension_numbers = #tpu.dot_dimension_numbers<[1], [1], [0], [0], [0, 0, 1, 0], [], []>} : vector<8x8xf32>, vector<16x8xf32>, vector<8x16xf32> -> vector<8x16xf32>
    %cst_15 = arith.constant dense<0xFF800000> : vector<8xf32>
    %39 = vector.multi_reduction <maximumf>, %38, %cst_15 [1] : vector<8x16xf32> to vector<8xf32>
    %40 = vector.shape_cast %39 : vector<8xf32> to vector<8x1xf32>
    %41 = vector.broadcast %40 : vector<8x1xf32> to vector<8x16xf32>
    %42 = arith.subf %38, %41 : vector<8x16xf32>
    %43 = math.exp %42 : vector<8x16xf32>
    %cst_16 = arith.constant dense<0.000000e+00> : vector<8xf32>
    %44 = vector.multi_reduction <add>, %43, %cst_16 [1] : vector<8x16xf32> to vector<8xf32>
    %45 = vector.shape_cast %44 : vector<8xf32> to vector<8x1xf32>
    %46 = tpu.reciprocal %45 {approx = true} : vector<8x1xf32> -> vector<8x1xf32>
    %47 = arith.mulf %45, %46 : vector<8x1xf32>
    %cst_17 = arith.constant 2.000000e+00 : f32
    %48 = vector.broadcast %cst_17 : f32 to vector<8x1xf32>
    %49 = arith.subf %48, %47 : vector<8x1xf32>
    %50 = arith.mulf %46, %49 : vector<8x1xf32>
    %51 = vector.broadcast %50 : vector<8x1xf32> to vector<8x16xf32>
    %52 = arith.mulf %43, %51 : vector<8x16xf32>
    %53 = vector.extract_strided_slice %14 {offsets = [0, 32], sizes = [16, 32], strides = [1, 1]} : vector<16x128xf32> to vector<16x32xf32>
    %cst_18 = arith.constant dense<0.000000e+00> : vector<8x32xf32>
    %54 = tpu.matmul %52, %53, %cst_18 {dimension_numbers = #tpu.dot_dimension_numbers<[1], [0], [0], [1], [0, 0, 1, 1], [], []>} : vector<8x16xf32>, vector<16x32xf32>, vector<8x32xf32> -> vector<8x32xf32>
    %55 = arith.addf %35, %54 : vector<8x32xf32>
    %56 = vector.extract_strided_slice %12 {offsets = [0, 16], sizes = [8, 8], strides = [1, 1]} : vector<8x32xf32> to vector<8x8xf32>
    %57 = vector.extract_strided_slice %13 {offsets = [0, 16], sizes = [16, 8], strides = [1, 1]} : vector<16x32xf32> to vector<16x8xf32>
    %cst_19 = arith.constant dense<0.000000e+00> : vector<8x16xf32>
    %58 = tpu.matmul %56, %57, %cst_19 {dimension_numbers = #tpu.dot_dimension_numbers<[1], [1], [0], [0], [0, 0, 1, 0], [], []>} : vector<8x8xf32>, vector<16x8xf32>, vector<8x16xf32> -> vector<8x16xf32>
    %cst_20 = arith.constant dense<0xFF800000> : vector<8xf32>
    %59 = vector.multi_reduction <maximumf>, %58, %cst_20 [1] : vector<8x16xf32> to vector<8xf32>
    %60 = vector.shape_cast %59 : vector<8xf32> to vector<8x1xf32>
    %61 = vector.broadcast %60 : vector<8x1xf32> to vector<8x16xf32>
    %62 = arith.subf %58, %61 : vector<8x16xf32>
    %63 = math.exp %62 : vector<8x16xf32>
    %cst_21 = arith.constant dense<0.000000e+00> : vector<8xf32>
    %64 = vector.multi_reduction <add>, %63, %cst_21 [1] : vector<8x16xf32> to vector<8xf32>
    %65 = vector.shape_cast %64 : vector<8xf32> to vector<8x1xf32>
    %66 = tpu.reciprocal %65 {approx = true} : vector<8x1xf32> -> vector<8x1xf32>
    %67 = arith.mulf %65, %66 : vector<8x1xf32>
    %cst_22 = arith.constant 2.000000e+00 : f32
    %68 = vector.broadcast %cst_22 : f32 to vector<8x1xf32>
    %69 = arith.subf %68, %67 : vector<8x1xf32>
    %70 = arith.mulf %66, %69 : vector<8x1xf32>
    %71 = vector.broadcast %70 : vector<8x1xf32> to vector<8x16xf32>
    %72 = arith.mulf %63, %71 : vector<8x16xf32>
    %73 = vector.extract_strided_slice %14 {offsets = [0, 64], sizes = [16, 32], strides = [1, 1]} : vector<16x128xf32> to vector<16x32xf32>
    %cst_23 = arith.constant dense<0.000000e+00> : vector<8x32xf32>
    %74 = tpu.matmul %72, %73, %cst_23 {dimension_numbers = #tpu.dot_dimension_numbers<[1], [0], [0], [1], [0, 0, 1, 1], [], []>} : vector<8x16xf32>, vector<16x32xf32>, vector<8x32xf32> -> vector<8x32xf32>
    %75 = arith.addf %55, %74 : vector<8x32xf32>
    %76 = vector.extract_strided_slice %12 {offsets = [0, 24], sizes = [8, 8], strides = [1, 1]} : vector<8x32xf32> to vector<8x8xf32>
    %77 = vector.extract_strided_slice %13 {offsets = [0, 24], sizes = [16, 8], strides = [1, 1]} : vector<16x32xf32> to vector<16x8xf32>
    %cst_24 = arith.constant dense<0.000000e+00> : vector<8x16xf32>
    %78 = tpu.matmul %76, %77, %cst_24 {dimension_numbers = #tpu.dot_dimension_numbers<[1], [1], [0], [0], [0, 0, 1, 0], [], []>} : vector<8x8xf32>, vector<16x8xf32>, vector<8x16xf32> -> vector<8x16xf32>
    %cst_25 = arith.constant dense<0xFF800000> : vector<8xf32>
    %79 = vector.multi_reduction <maximumf>, %78, %cst_25 [1] : vector<8x16xf32> to vector<8xf32>
    %80 = vector.shape_cast %79 : vector<8xf32> to vector<8x1xf32>
    %81 = vector.broadcast %80 : vector<8x1xf32> to vector<8x16xf32>
    %82 = arith.subf %78, %81 : vector<8x16xf32>
    %83 = math.exp %82 : vector<8x16xf32>
    %cst_26 = arith.constant dense<0.000000e+00> : vector<8xf32>
    %84 = vector.multi_reduction <add>, %83, %cst_26 [1] : vector<8x16xf32> to vector<8xf32>
    %85 = vector.shape_cast %84 : vector<8xf32> to vector<8x1xf32>
    %86 = tpu.reciprocal %85 {approx = true} : vector<8x1xf32> -> vector<8x1xf32>
    %87 = arith.mulf %85, %86 : vector<8x1xf32>
    %cst_27 = arith.constant 2.000000e+00 : f32
    %88 = vector.broadcast %cst_27 : f32 to vector<8x1xf32>
    %89 = arith.subf %88, %87 : vector<8x1xf32>
    %90 = arith.mulf %86, %89 : vector<8x1xf32>
    %91 = vector.broadcast %90 : vector<8x1xf32> to vector<8x16xf32>
    %92 = arith.mulf %83, %91 : vector<8x16xf32>
    %93 = vector.extract_strided_slice %14 {offsets = [0, 96], sizes = [16, 32], strides = [1, 1]} : vector<16x128xf32> to vector<16x32xf32>
    %cst_28 = arith.constant dense<0.000000e+00> : vector<8x32xf32>
    %94 = tpu.matmul %92, %93, %cst_28 {dimension_numbers = #tpu.dot_dimension_numbers<[1], [0], [0], [1], [0, 0, 1, 1], [], []>} : vector<8x16xf32>, vector<16x32xf32>, vector<8x32xf32> -> vector<8x32xf32>
    %95 = arith.addf %75, %94 : vector<8x32xf32>
    %c0_29 = arith.constant 0 : index
    %c0_30 = arith.constant 0 : index
    %c0_31 = arith.constant 0 : index
    %96 = vector.load %arg4[%c0_29, %c0_30, %c0_31] : memref<2x8x32xf32, #tpu.memory_space<vmem>>, vector<1x8x32xf32>
    %97 = vector.shape_cast %96 : vector<1x8x32xf32> to vector<8x32xf32>
    %98 = vector.shape_cast %95 : vector<8x32xf32> to vector<1x8x32xf32>
    tpu.vector_store %arg4[%c0_29, %c0_30, %c0_31], %98 {strides = array<i32>} : memref<2x8x32xf32, #tpu.memory_space<vmem>>, vector<1x8x32xf32>,
    %99 = vector.extract_strided_slice %10 {offsets = [8, 0], sizes = [8, 32], strides = [1, 1]} : vector<16x32xf32> to vector<8x32xf32>
    %100 = vector.extract_strided_slice %11 {offsets = [16, 0], sizes = [16, 32], strides = [1, 1]} : vector<32x32xf32> to vector<16x32xf32>
    %101 = vector.extract_strided_slice %9 {offsets = [16, 0], sizes = [16, 128], strides = [1, 1]} : vector<32x128xf32> to vector<16x128xf32>
    %cst_32 = arith.constant 0.000000e+00 : f32
    %102 = vector.broadcast %cst_32 : f32 to vector<8x32xf32>
    %103 = vector.extract_strided_slice %99 {offsets = [0, 0], sizes = [8, 8], strides = [1, 1]} : vector<8x32xf32> to vector<8x8xf32>
    %104 = vector.extract_strided_slice %100 {offsets = [0, 0], sizes = [16, 8], strides = [1, 1]} : vector<16x32xf32> to vector<16x8xf32>
    %cst_33 = arith.constant dense<0.000000e+00> : vector<8x16xf32>
    %105 = tpu.matmul %103, %104, %cst_33 {dimension_numbers = #tpu.dot_dimension_numbers<[1], [1], [0], [0], [0, 0, 1, 0], [], []>} : vector<8x8xf32>, vector<16x8xf32>, vector<8x16xf32> -> vector<8x16xf32>
    %cst_34 = arith.constant dense<0xFF800000> : vector<8xf32>
    %106 = vector.multi_reduction <maximumf>, %105, %cst_34 [1] : vector<8x16xf32> to vector<8xf32>
    %107 = vector.shape_cast %106 : vector<8xf32> to vector<8x1xf32>
    %108 = vector.broadcast %107 : vector<8x1xf32> to vector<8x16xf32>
    %109 = arith.subf %105, %108 : vector<8x16xf32>
    %110 = math.exp %109 : vector<8x16xf32>
    %cst_35 = arith.constant dense<0.000000e+00> : vector<8xf32>
    %111 = vector.multi_reduction <add>, %110, %cst_35 [1] : vector<8x16xf32> to vector<8xf32>
    %112 = vector.shape_cast %111 : vector<8xf32> to vector<8x1xf32>
    %113 = tpu.reciprocal %112 {approx = true} : vector<8x1xf32> -> vector<8x1xf32>
    %114 = arith.mulf %112, %113 : vector<8x1xf32>
    %cst_36 = arith.constant 2.000000e+00 : f32
    %115 = vector.broadcast %cst_36 : f32 to vector<8x1xf32>
    %116 = arith.subf %115, %114 : vector<8x1xf32>
    %117 = arith.mulf %113, %116 : vector<8x1xf32>
    %118 = vector.broadcast %117 : vector<8x1xf32> to vector<8x16xf32>
    %119 = arith.mulf %110, %118 : vector<8x16xf32>
    %120 = vector.extract_strided_slice %101 {offsets = [0, 0], sizes = [16, 32], strides = [1, 1]} : vector<16x128xf32> to vector<16x32xf32>
    %cst_37 = arith.constant dense<0.000000e+00> : vector<8x32xf32>
    %121 = tpu.matmul %119, %120, %cst_37 {dimension_numbers = #tpu.dot_dimension_numbers<[1], [0], [0], [1], [0, 0, 1, 1], [], []>} : vector<8x16xf32>, vector<16x32xf32>, vector<8x32xf32> -> vector<8x32xf32>
    %122 = arith.addf %102, %121 : vector<8x32xf32>
    %123 = vector.extract_strided_slice %99 {offsets = [0, 8], sizes = [8, 8], strides = [1, 1]} : vector<8x32xf32> to vector<8x8xf32>
    %124 = vector.extract_strided_slice %100 {offsets = [0, 8], sizes = [16, 8], strides = [1, 1]} : vector<16x32xf32> to vector<16x8xf32>
    %cst_38 = arith.constant dense<0.000000e+00> : vector<8x16xf32>
    %125 = tpu.matmul %123, %124, %cst_38 {dimension_numbers = #tpu.dot_dimension_numbers<[1], [1], [0], [0], [0, 0, 1, 0], [], []>} : vector<8x8xf32>, vector<16x8xf32>, vector<8x16xf32> -> vector<8x16xf32>
    %cst_39 = arith.constant dense<0xFF800000> : vector<8xf32>
    %126 = vector.multi_reduction <maximumf>, %125, %cst_39 [1] : vector<8x16xf32> to vector<8xf32>
    %127 = vector.shape_cast %126 : vector<8xf32> to vector<8x1xf32>
    %128 = vector.broadcast %127 : vector<8x1xf32> to vector<8x16xf32>
    %129 = arith.subf %125, %128 : vector<8x16xf32>
    %130 = math.exp %129 : vector<8x16xf32>
    %cst_40 = arith.constant dense<0.000000e+00> : vector<8xf32>
    %131 = vector.multi_reduction <add>, %130, %cst_40 [1] : vector<8x16xf32> to vector<8xf32>
    %132 = vector.shape_cast %131 : vector<8xf32> to vector<8x1xf32>
    %133 = tpu.reciprocal %132 {approx = true} : vector<8x1xf32> -> vector<8x1xf32>
    %134 = arith.mulf %132, %133 : vector<8x1xf32>
    %cst_41 = arith.constant 2.000000e+00 : f32
    %135 = vector.broadcast %cst_41 : f32 to vector<8x1xf32>
    %136 = arith.subf %135, %134 : vector<8x1xf32>
    %137 = arith.mulf %133, %136 : vector<8x1xf32>
    %138 = vector.broadcast %137 : vector<8x1xf32> to vector<8x16xf32>
    %139 = arith.mulf %130, %138 : vector<8x16xf32>
    %140 = vector.extract_strided_slice %101 {offsets = [0, 32], sizes = [16, 32], strides = [1, 1]} : vector<16x128xf32> to vector<16x32xf32>
    %cst_42 = arith.constant dense<0.000000e+00> : vector<8x32xf32>
    %141 = tpu.matmul %139, %140, %cst_42 {dimension_numbers = #tpu.dot_dimension_numbers<[1], [0], [0], [1], [0, 0, 1, 1], [], []>} : vector<8x16xf32>, vector<16x32xf32>, vector<8x32xf32> -> vector<8x32xf32>
    %142 = arith.addf %122, %141 : vector<8x32xf32>
    %143 = vector.extract_strided_slice %99 {offsets = [0, 16], sizes = [8, 8], strides = [1, 1]} : vector<8x32xf32> to vector<8x8xf32>
    %144 = vector.extract_strided_slice %100 {offsets = [0, 16], sizes = [16, 8], strides = [1, 1]} : vector<16x32xf32> to vector<16x8xf32>
    %cst_43 = arith.constant dense<0.000000e+00> : vector<8x16xf32>
    %145 = tpu.matmul %143, %144, %cst_43 {dimension_numbers = #tpu.dot_dimension_numbers<[1], [1], [0], [0], [0, 0, 1, 0], [], []>} : vector<8x8xf32>, vector<16x8xf32>, vector<8x16xf32> -> vector<8x16xf32>
    %cst_44 = arith.constant dense<0xFF800000> : vector<8xf32>
    %146 = vector.multi_reduction <maximumf>, %145, %cst_44 [1] : vector<8x16xf32> to vector<8xf32>
    %147 = vector.shape_cast %146 : vector<8xf32> to vector<8x1xf32>
    %148 = vector.broadcast %147 : vector<8x1xf32> to vector<8x16xf32>
    %149 = arith.subf %145, %148 : vector<8x16xf32>
    %150 = math.exp %149 : vector<8x16xf32>
    %cst_45 = arith.constant dense<0.000000e+00> : vector<8xf32>
    %151 = vector.multi_reduction <add>, %150, %cst_45 [1] : vector<8x16xf32> to vector<8xf32>
    %152 = vector.shape_cast %151 : vector<8xf32> to vector<8x1xf32>
    %153 = tpu.reciprocal %152 {approx = true} : vector<8x1xf32> -> vector<8x1xf32>
    %154 = arith.mulf %152, %153 : vector<8x1xf32>
    %cst_46 = arith.constant 2.000000e+00 : f32
    %155 = vector.broadcast %cst_46 : f32 to vector<8x1xf32>
    %156 = arith.subf %155, %154 : vector<8x1xf32>
    %157 = arith.mulf %153, %156 : vector<8x1xf32>
    %158 = vector.broadcast %157 : vector<8x1xf32> to vector<8x16xf32>
    %159 = arith.mulf %150, %158 : vector<8x16xf32>
    %160 = vector.extract_strided_slice %101 {offsets = [0, 64], sizes = [16, 32], strides = [1, 1]} : vector<16x128xf32> to vector<16x32xf32>
    %cst_47 = arith.constant dense<0.000000e+00> : vector<8x32xf32>
    %161 = tpu.matmul %159, %160, %cst_47 {dimension_numbers = #tpu.dot_dimension_numbers<[1], [0], [0], [1], [0, 0, 1, 1], [], []>} : vector<8x16xf32>, vector<16x32xf32>, vector<8x32xf32> -> vector<8x32xf32>
    %162 = arith.addf %142, %161 : vector<8x32xf32>
    %163 = vector.extract_strided_slice %99 {offsets = [0, 24], sizes = [8, 8], strides = [1, 1]} : vector<8x32xf32> to vector<8x8xf32>
    %164 = vector.extract_strided_slice %100 {offsets = [0, 24], sizes = [16, 8], strides = [1, 1]} : vector<16x32xf32> to vector<16x8xf32>
    %cst_48 = arith.constant dense<0.000000e+00> : vector<8x16xf32>
    %165 = tpu.matmul %163, %164, %cst_48 {dimension_numbers = #tpu.dot_dimension_numbers<[1], [1], [0], [0], [0, 0, 1, 0], [], []>} : vector<8x8xf32>, vector<16x8xf32>, vector<8x16xf32> -> vector<8x16xf32>
    %cst_49 = arith.constant dense<0xFF800000> : vector<8xf32>
    %166 = vector.multi_reduction <maximumf>, %165, %cst_49 [1] : vector<8x16xf32> to vector<8xf32>
    %167 = vector.shape_cast %166 : vector<8xf32> to vector<8x1xf32>
    %168 = vector.broadcast %167 : vector<8x1xf32> to vector<8x16xf32>
    %169 = arith.subf %165, %168 : vector<8x16xf32>
    %170 = math.exp %169 : vector<8x16xf32>
    %cst_50 = arith.constant dense<0.000000e+00> : vector<8xf32>
    %171 = vector.multi_reduction <add>, %170, %cst_50 [1] : vector<8x16xf32> to vector<8xf32>
    %172 = vector.shape_cast %171 : vector<8xf32> to vector<8x1xf32>
    %173 = tpu.reciprocal %172 {approx = true} : vector<8x1xf32> -> vector<8x1xf32>
    %174 = arith.mulf %172, %173 : vector<8x1xf32>
    %cst_51 = arith.constant 2.000000e+00 : f32
    %175 = vector.broadcast %cst_51 : f32 to vector<8x1xf32>
    %176 = arith.subf %175, %174 : vector<8x1xf32>
    %177 = arith.mulf %173, %176 : vector<8x1xf32>
    %178 = vector.broadcast %177 : vector<8x1xf32> to vector<8x16xf32>
    %179 = arith.mulf %170, %178 : vector<8x16xf32>
    %180 = vector.extract_strided_slice %101 {offsets = [0, 96], sizes = [16, 32], strides = [1, 1]} : vector<16x128xf32> to vector<16x32xf32>
    %cst_52 = arith.constant dense<0.000000e+00> : vector<8x32xf32>
    %181 = tpu.matmul %179, %180, %cst_52 {dimension_numbers = #tpu.dot_dimension_numbers<[1], [0], [0], [1], [0, 0, 1, 1], [], []>} : vector<8x16xf32>, vector<16x32xf32>, vector<8x32xf32> -> vector<8x32xf32>
    %182 = arith.addf %162, %181 : vector<8x32xf32>
    %c1 = arith.constant 1 : index
    %c0_53 = arith.constant 0 : index
    %c0_54 = arith.constant 0 : index
    %183 = vector.load %arg4[%c1, %c0_53, %c0_54] : memref<2x8x32xf32, #tpu.memory_space<vmem>>, vector<1x8x32xf32>
    %184 = vector.shape_cast %183 : vector<1x8x32xf32> to vector<8x32xf32>
    %185 = vector.shape_cast %182 : vector<8x32xf32> to vector<1x8x32xf32>
    tpu.vector_store %arg4[%c1, %c0_53, %c0_54], %185 {strides = array<i32>} : memref<2x8x32xf32, #tpu.memory_space<vmem>>, vector<1x8x32xf32>,
    return
  }
  func.func @transform_0(%arg0: i32) -> (i32, i32, i32) {
    %c0_i32 = arith.constant 0 : i32
    %c0_i32_0 = arith.constant 0 : i32
    %c0_i32_1 = arith.constant 0 : i32
    return %arg0, %c0_i32, %c0_i32_0 : i32, i32, i32
  }
  func.func @transform_1(%arg0: i32) -> (i32, i32, i32) {
    %c0_i32 = arith.constant 0 : i32
    %c0_i32_0 = arith.constant 0 : i32
    %c0_i32_1 = arith.constant 0 : i32
    return %arg0, %c0_i32, %c0_i32_0 : i32, i32, i32
  }
  func.func @transform_2(%arg0: i32) -> (i32, i32) {
    %c0_i32 = arith.constant 0 : i32
    %c0_i32_0 = arith.constant 0 : i32
    %c0_i32_1 = arith.constant 0 : i32
    return %c0_i32, %c0_i32_0 : i32, i32
  }
  func.func @transform_3(%arg0: i32) -> (i32, i32, i32) {
    %c0_i32 = arith.constant 0 : i32
    %c0_i32_0 = arith.constant 0 : i32
    %c0_i32_1 = arith.constant 0 : i32
    return %arg0, %c0_i32, %c0_i32_0 : i32, i32, i32
  }
}

</mosaic_0001>

<bundles_post_ra>
// kernel: tpu_custom_call.1
= control target key start
LH: loop header
LB: loop body
LE: loop exit
PB: predicated region body
PF: predicated region fallthrough
CT: control target
= control target key end

     0   :  { %8 = vsyncpa [#allocation3], 0  ;;  %s2229_s0 = inlined_call_operand.hbm [shape: f32[2,8,32], index: 0, kind: input, shape index: {}]   ;;  %s2230_s1 = inlined_call_operand.hbm [shape: f32[2,16,32], index: 1, kind: input, shape index: {}]   ;;  %s2231_s2 = inlined_call_operand.hbm [shape: f32[32,192], index: 2, kind: input, shape index: {}]   ;;  %s2232_s3 = inlined_call_operand.hbm [shape: f32[2,8,32], index: 3, kind: output, shape index: {}]  }
   0x1   :  { %9 = vsyncpa [#allocation6], 0 }
   0x2   :  { %10 = vsyncpa [#allocation4], 0  ;;  %s1946_s12 = smov [#allocation5]   ;;  %s1947_s14 = smov [#allocation2]  }
   0x3   :  { %s28_s13 = sshll.u32 %s1946_s12, 4  ;;  %s16_s15 = sshll.u32 %s1947_s14, 4  ;;  %s29_s13 = int_to_ptr.vmem [resolvable:$true] %s28_s13  ;;  %s17_s15 = int_to_ptr.vmem [resolvable:$true] %s16_s15 }
   0x4   :  { %s1868_s16 = scalar_lea.vmem %s29_s13, 512  ;;  %p1873_p1 = scmp.lt.s32.totalorder %s29_s13, %s29_s13 }
   0x5   :  { %p1869_p0 = scmp.ne.s32.totalorder %s29_s13, %s1868_s16  ;;  %p1874_p2 = scmp.lt.s32.totalorder %s1868_s16, %s1868_s16 }
   0x7   :  { %p1875_p3 = por %p1874_p2, %p1873_p1 }
   0x9   :  { %p1876_p4 = pnand %p1875_p3, %p1869_p0 }
   0xb   :  { %1879 = shalt.err (!%p1876_p4)
}
   0xc   :  { %s1948_s17 = smov 128   ;;  %s1949_s18 = smov 8  }
   0xd   :  { %34 = dma.hbm_to_vmem [thread:$0]  %s2230_s1, 512, %s29_s13, [#allocation6], %s1948_s17, %s1948_s17, %s1949_s18  }
   0xe   :  { %s1888_s21 = scalar_lea.vmem %s17_s15, 256  ;;  %p1893_p6 = scmp.lt.s32.totalorder %s17_s15, %s17_s15 }
   0xf   :  { %p1889_p5 = scmp.ne.s32.totalorder %s17_s15, %s1888_s21  ;;  %p1894_p7 = scmp.lt.s32.totalorder %s1888_s21, %s1888_s21 }
  0x11   :  { %p1895_p8 = por %p1894_p7, %p1893_p6 }
  0x13   :  { %p1896_p9 = pnand %p1895_p8, %p1889_p5 }
  0x15   :  { %1899 = shalt.err (!%p1896_p9)
}
  0x16   :  { %22 = dma.hbm_to_vmem [thread:$0]  %s2229_s0, 256, %s17_s15, [#allocation3], %s1948_s17, %s1948_s17, %s1949_s18  }
  0x17   :  { %s1950_s24 = smov [#allocation7]  }
  0x18   :  { %s40_s25 = sshll.u32 %s1950_s24, 4  ;;  %s41_s25 = int_to_ptr.vmem [resolvable:$true] %s40_s25 }
  0x19   :  { %s1908_s26 = scalar_lea.vmem %s41_s25, 1024  ;;  %p1913_p11 = scmp.lt.s32.totalorder %s41_s25, %s41_s25 }
  0x1a   :  { %p1909_p10 = scmp.ne.s32.totalorder %s41_s25, %s1908_s26  ;;  %p1914_p12 = scmp.lt.s32.totalorder %s1908_s26, %s1908_s26 }
  0x1c   :  { %p1915_p13 = por %p1914_p12, %p1913_p11 }
  0x1e   :  { %p1916_p0 = pnand %p1915_p13, %p1909_p10 }
  0x20   :  { %1919 = shalt.err (!%p1916_p0)
}
  0x21   :  { %s1951_s1 = smov 256   ;;  %s1952_s27 = smov 16  }
  0x22   :  { %46 = dma.hbm_to_vmem [thread:$0]  %s2231_s2, 1024, %s41_s25, [#allocation6], %s1951_s1, %s1951_s1, %s1952_s27  }
  0x23   :  { %1940 = dma.done.wait [#allocation3], 256  }
  0x24   :  { %1941 = vsyncadd [#allocation3], 4294967040 }
  0x25   :  { %1942 = dma.done.wait [#allocation6], 1536  }
  0x26   :  { %1943 = vsyncadd [#allocation6], 4294965760  ;;  %v1953_v0 = vmov 0.0   ;;  %v71_v1 = vld [vmem:[#allocation7 + $0x38] sm:$0xff]  ;;  %v70_v2 = vld [vmem:[#allocation7 + $0x30] sm:$0xff]  ;;  %vm72_vm0 = vcmask 261120  }
  0x27   :  { %155 = vmatprep.mubr.f32.mxu0 %v1953_v0  ;;  %1697 = vmatprep.subr.mxu1 %v1953_v0  ;;  %v69_v3 = vld [vmem:[#allocation7 + $0x28] sm:$0xff]  ;;  %v68_v4 = vld [vmem:[#allocation7 + $0x20] sm:$0xff]  ;;  %v67_v5 = vld [vmem:[#allocation7 + $0x18] sm:$0xff]  ;;  %vm1954_vm1 = vmmov 0   ;;  %s1955_s0 = smov 88   ;;  %s1956_s2 = smov 96  }
  0x28   :  { %115 = vmatprep.subr.mxu0 %v71_v1  ;;  %v56_v6 = vld [vmem:[#allocation2] sm:$0xff]  ;;  %v65_v8 = vld [vmem:[#allocation7 + $0x8] sm:$0xff]  ;;  %v64_v9 = vld [vmem:[#allocation7] sm:$0xff]  ;;  %1701 = vmatprep.mubr.msk.f32.mxu1 %vm1954_vm1, %v1953_v0  ;;  %s1957_s30 = smov 80   ;;  %s1958_s4 = smov 120   ;;  %vm196_vm2 = vcmask 64512  }
  0x29   :  { %116 = vmatpush1.msra.mxu0 %v70_v2  ;;  %v66_v7 = vld [vmem:[#allocation7 + $0x10] sm:$0xff]  ;;  %v58_v10 = vmul.f32 0.35355338, %v56_v6  ;;  %v57_v11 = vld [vmem:[#allocation2 + $0x8] sm:$0xff]  ;;  %v60_v13 = vld [vmem:[#allocation5] sm:$0xff]  ;;  %s1959_s5 = smov 112  }
  0x2a   :  { %117 = vmatprep.subr.mxu0 %v69_v3  ;;  %v59_v12 = vmul.f32 0.35355338, %v57_v11  ;;  %v61_v14 = vld [vmem:[#allocation5 + $0x8] sm:$0xff]  ;;  %v62_v19 = vld [vmem:[#allocation5 + $0x10] sm:$0xff]  ;;  %v63_v22 = vld [vmem:[#allocation5 + $0x18] sm:$0xff]  ;;  %vm274_vm3 = vcmask 130048  }
  0x2b   :  { %118 = vmatpush1.msra.mxu0 %v68_v4  ;;  %s1960_s6 = smov 64   ;;  %s1961_s7 = smov 72  }
  0x2c   :  { %119 = vmatprep.subr.mxu0 %v67_v5  ;;  %s1962_s8 = smov 104   ;;  %s1963_s9 = smov 32  }
  0x2d   :  { %120 = vmatpush1.msra.mxu0 %v66_v7  ;;  %s1964_s10 = smov [#allocation8]  }
  0x2e   :  { %121 = vmatprep.subr.mxu0 %v65_v8  ;;  %s1598_s11 = sshll.u32 %s1964_s10, 4  ;;  %s1599_s11 = int_to_ptr.vmem [resolvable:$true] %s1598_s11 }
  0x2f   :  { %122 = vmatpush1.msra.mxu0 %v64_v9  ;;  %s1920_s12 = scalar_lea.vmem %s1599_s11, 256  ;;  %p1925_p2 = scmp.lt.s32.totalorder %s1599_s11, %s1599_s11 }
  0x30   :  { %1611 = vmatmul.mubr.msk.f32.vlgmr.msra.gmra.mxu0 %vm72_vm0, %v58_v10  ;;  %1725 = vmatprep.subr.mxu0 %v1953_v0  ;;  %p1921_p1 = scmp.ne.s32.totalorder %s1599_s11, %s1920_s12  ;;  %p1926_p3 = scmp.lt.s32.totalorder %s1920_s12, %s1920_s12 }
  0x31   :  { %160 = vmatprep.mubr.f32.mxu0 %v1953_v0 }
  0x32   :  { %p1927_p4 = por %p1926_p3, %p1925_p2 }
  0x34   :  { %1612 = vmatmul.mubr.msk.f32.gmra.mxu0 %vm72_vm0, %v59_v12  ;;  %p1928_p5 = pnand %p1927_p4, %p1921_p1 }
  0x35   :  { %165 = vmatprep.mubr.f32.mxu0 %v1953_v0 }
  0x38   :  { %1613 = vmatmul.mubr.msk.f32.gmra.mxu0 %vm72_vm0, %v60_v13 }
  0x39   :  { %171 = vmatprep.mubr.f32.mxu0 %v1953_v0 }
  0x3c   :  { %1614 = vmatmul.mubr.msk.f32.gmra.mxu0 %vm72_vm0, %v61_v14 }
  0x3d   :  { %177 = vmatprep.mubr.f32.mxu0 %v1953_v0 }
  0x40   :  { %1615 = vmatmul.mubr.msk.f32.gmra.mxu0 %vm72_vm0, %v62_v19 }
  0x41   :  { %183 = vmatprep.mubr.f32.mxu0 %v1953_v0 }
  0x44   :  { %1616 = vmatmul.mubr.msk.f32.gmra.mxu0 %vm72_vm0, %v63_v22 }
  0x45   :  { %1729 = vmatprep.mubr.msk.f32.mxu0 %vm1954_vm1, %v1953_v0 }
  0xf0   :  { %v157_v15 = vpop.f32.mrf.mxu0 }
  0xf2   :  { %v2011_v16 = vpop.f32.mrf.mxu0 }
  0xf4   :  { %v162_v17 = vpop.f32.mrf.mxu0 }
  0xf6   :  { %v2013_v18 = vpop.f32.mrf.mxu0 }
  0xf8   :  { %v2018_v20 = vpop.f32.mrf.mxu0 }
  0xfa   :  { %v2021_v21 = vpop.f32.mrf.mxu0 }
  0xfc   :  { %v2024_v23 = vpop.f32.mrf.mxu0 }
  0xfe   :  { %v2028_v24 = vpop.f32.mrf.mxu0 }
  0xff   :  { %293 = vrot.lane.b32.xlu1 %v2028_v24, %s1955_s0  ;;  %194 = vrot.lane.b32.xlu0 %v2028_v24, %s1956_s2 }
 0x100   :  { %v2068_v33 = vpop.f32.mrf.mxu0 }
 0x102   :  { %v2070_v34 = vpop.f32.mrf.mxu0 }
 0x103   :  { %291 = vrot.lane.b32.xlu1 %v2021_v21, %s1955_s0  ;;  %192 = vrot.lane.b32.xlu0 %v2021_v21, %s1956_s2 }
 0x104   :  { %v2072_v36 = vpop.f32.mrf.mxu0 }
 0x106   :  { %v2075_v39 = vpop.f32.mrf.mxu0 }
 0x107   :  { %543 = vrot.lane.b32.xlu1 %v2028_v24, %s1957_s30  ;;  %289 = vrot.lane.b32.xlu0 %v2011_v16, %s1958_s4 }
 0x10b   :  { %539 = vrot.lane.b32.xlu1 %v2011_v16, %s1959_s5  ;;  %541 = vrot.lane.b32.xlu0 %v2021_v21, %s1957_s30 }
 0x171   :  { %v294_v25 = vpop.permute.xlu1 %293  ;;  %v195_v26 = vpop.permute.xlu0 %194 }
 0x172   :  { %1698 = vmatpush3.xpose.msk.msra.mxu1 %vm196_vm2, %v195_v26 }
 0x173   :  { %1699 = vmatprep.subr.mxu1 %v1953_v0 }
 0x175   :  { %v292_v27 = vpop.permute.xlu1 %291  ;;  %v193_v28 = vpop.permute.xlu0 %192 }
 0x176   :  { %1700 = vmatpush3.xpose.msk.msra.mxu1 %vm196_vm2, %v193_v28 }
 0x177   :  { %1704 = vmatprep.subr.mxu1 %v1953_v0 }
 0x179   :  { %v544_v29 = vpop.permute.xlu1 %543  ;;  %1702 = vmatmul.mubr.msk.f32.vlgmr.msra.gmra.mxu1 %vm196_vm2, %v2011_v16  ;;  %v290_v30 = vpop.permute.xlu0 %289 }
 0x17a   :  { %1705 = vmatpush3.xpose.msk.msra.mxu1 %vm196_vm2, %v294_v25  ;;  %1726 = vmatpush3.xpose.msk.msra.mxu0 %vm196_vm2, %v544_v29 }
 0x17b   :  { %1727 = vmatprep.subr.mxu0 %v1953_v0  ;;  %1706 = vmatprep.subr.mxu1 %v1953_v0 }
 0x17c   :  { %1708 = vmatprep.mubr.msk.f32.mxu1 %vm1954_vm1, %v1953_v0 }
 0x17d   :  { %v542_v31 = vpop.permute.xlu0 %541  ;;  %v540_v32 = vpop.permute.xlu1 %539 }
 0x17e   :  { %1707 = vmatpush3.xpose.msk.msra.mxu1 %vm196_vm2, %v292_v27  ;;  %1728 = vmatpush3.xpose.msk.msra.mxu0 %vm196_vm2, %v542_v31 }
 0x17f   :  { %1711 = vmatprep.subr.mxu1 %v1953_v0  ;;  %1746 = vmatprep.subr.mxu0 %v1953_v0 }
 0x181   :  { %1709 = vmatmul.mubr.msk.f32.vlgmr.msra.gmra.mxu1 %vm196_vm2, %v290_v30  ;;  %1730 = vmatmul.mubr.msk.f32.vlgmr.msra.gmra.mxu0 %vm196_vm2, %v540_v32 }
 0x182   :  { %1715 = vmatprep.mubr.msk.f32.mxu1 %vm1954_vm1, %v1953_v0  ;;  %1750 = vmatprep.mubr.msk.f32.mxu0 %vm1954_vm1, %v1953_v0 }
 0x239   :  { %v270_v35 = vpop.f32.mrf.mxu1 }
 0x23a   :  { %v275_v37 = vsel %vm274_vm3, %v270_v35, -inf }
 0x23b   :  { %276 = vmax.xlane.f32.xlu1 %v275_v37  ;;  %v1703_v38 = vpop.f32.mrf.mxu1 }
 0x241   :  { %v367_v40 = vpop.f32.mrf.mxu1  ;;  %v617_v41 = vpop.f32.mrf.mxu0 }
 0x242   :  { %v371_v42 = vsel %vm274_vm3, %v367_v40, -inf  ;;  %v621_v45 = vsel %vm274_vm3, %v617_v41, -inf }
 0x243   :  { %372 = vmax.xlane.f32.xlu0 %v371_v42  ;;  %v1710_v43 = vpop.f32.mrf.mxu1  ;;  %v1731_v44 = vpop.f32.mrf.mxu0 }
 0x247   :  { %622 = vmax.xlane.f32.xlu0 %v621_v45 }
 0x2c4   :  { %v277_v46 = vpop.xlane.xlu1 %276 }
 0x2c5   :  { %v278_v47 = vsub.f32 %v270_v35, %v277_v46 }
 0x2c7   :  { %v279_v48 = vmul.f32 1.442695, %v278_v47 }
 0x2c9   :  { %1828 = vpow2.f32 %v279_v48 }
 0x2cc   :  { %v373_v49 = vpop.xlane.xlu0 %372 }
 0x2cd   :  { %v374_v50 = vsub.f32 %v367_v40, %v373_v49 }
 0x2cf   :  { %v375_v51 = vmul.f32 1.442695, %v374_v50 }
 0x2d0   :  { %v623_v52 = vpop.xlane.xlu0 %622 }
 0x2d1   :  { %1830 = vpow2.f32 %v375_v51  ;;  %v624_v53 = vsub.f32 %v617_v41, %v623_v52 }
 0x2d3   :  { %v625_v54 = vmul.f32 1.442695, %v624_v53 }
 0x2d5   :  { %1832 = vpow2.f32 %v625_v54 }
 0x2d6   :  { %v1829_v55 = vpop.eup %1828 }
 0x2d7   :  { %v281_v56 = vsel %vm274_vm3, %v1829_v55, 0.0 }
 0x2d8   :  { %282 = vadd.xlane.f32.xlu1 %v281_v56 }
 0x2de   :  { %v1831_v57 = vpop.eup %1830 }
 0x2df   :  { %v377_v58 = vsel %vm274_vm3, %v1831_v57, 0.0 }
 0x2e0   :  { %378 = vadd.xlane.f32.xlu0 %v377_v58 }
 0x2e2   :  { %v1833_v59 = vpop.eup %1832 }
 0x2e3   :  { %v627_v60 = vsel %vm274_vm3, %v1833_v59, 0.0 }
 0x2e4   :  { %628 = vadd.xlane.f32.xlu0 %v627_v60 }
 0x2e9   :  { %389 = vrot.lane.b32.xlu1 %v2024_v23, %s1956_s2 }
 0x2ed   :  { %637 = vrot.lane.b32.xlu1 %v2024_v23, %s1960_s6 }
 0x2f1   :  { %635 = vrot.lane.b32.xlu1 %v2018_v20, %s1960_s6 }
 0x2f5   :  { %717 = vrot.lane.b32.xlu1 %v2021_v21, %s1961_s7 }
 0x2f9   :  { %993 = vrot.lane.b32.xlu1 %v2075_v39, %s1955_s0 }
 0x2fa   :  { %387 = vrot.lane.b32.xlu0 %v2018_v20, %s1956_s2 }
 0x2fd   :  { %989 = vrot.lane.b32.xlu1 %v2013_v18, %s1958_s4 }
 0x2fe   :  { %719 = vrot.lane.b32.xlu0 %v2028_v24, %s1961_s7 }
 0x302   :  { %715 = vrot.lane.b32.xlu0 %v2011_v16, %s1962_s8 }
 0x306   :  { %991 = vrot.lane.b32.xlu0 %v2070_v34, %s1955_s0 }
 0x361   :  { %v283_v61 = vpop.xlane.xlu1 %282 }
 0x362   :  { %1834 = vrcp.f32 %v283_v61 }
 0x365   :  { %v390_v62 = vpop.permute.xlu1 %389 }
 0x366   :  { %1712 = vmatpush3.msra.mxu1 %v390_v62 }
 0x367   :  { %1713 = vmatprep.subr.mxu1 %v1953_v0 }
 0x369   :  { %v379_v63 = vpop.xlane.xlu0 %378  ;;  %v638_v13 = vpop.permute.xlu1 %637 }
 0x36a   :  { %1836 = vrcp.f32 %v379_v63 }
 0x36d   :  { %v629_v1 = vpop.xlane.xlu0 %628  ;;  %v636_v19 = vpop.permute.xlu1 %635 }
 0x36e   :  { %1838 = vrcp.f32 %v629_v1 }
 0x36f   :  { %v1835_v3 = vpop.eup %1834 }
 0x370   :  { %v285_v4 = vmul.f32 %v1835_v3, %v283_v61 }
 0x371   :  { %v388_v2 = vpop.permute.xlu0 %387  ;;  %v718_v24 = vpop.permute.xlu1 %717 }
 0x372   :  { %1714 = vmatpush3.msra.mxu1 %v388_v2  ;;  %v286_v7 = vsub.f32 2.0, %v285_v4 }
 0x373   :  { %1718 = vmatprep.subr.mxu1 %v1953_v0 }
 0x374   :  { %v287_v12 = vmul.f32 %v1835_v3, %v286_v7 }
 0x375   :  { %v720_v22 = vpop.permute.xlu0 %719  ;;  %v994_v26 = vpop.permute.xlu1 %993 }
 0x376   :  { %v288_v16 = vmul.f32 %v1829_v55, %v287_v12 }
 0x377   :  { %v1837_v5 = vpop.eup %1836 }
 0x378   :  { %v381_v6 = vmul.f32 %v1837_v5, %v379_v63 }
 0x379   :  { %v716_v25 = vpop.permute.xlu0 %715  ;;  %v990_v28 = vpop.permute.xlu1 %989 }
 0x37a   :  { %v382_v8 = vsub.f32 2.0, %v381_v6 }
 0x37b   :  { %v1839_v9 = vpop.eup %1838 }
 0x37c   :  { %v383_v10 = vmul.f32 %v1837_v5, %v382_v8  ;;  %v631_v11 = vmul.f32 %v1839_v9, %v629_v1 }
 0x37d   :  { %v992_v27 = vpop.permute.xlu0 %991 }
 0x37e   :  { %v384_v14 = vmul.f32 %v1831_v57, %v383_v10  ;;  %v632_v15 = vsub.f32 2.0, %v631_v11 }
 0x380   :  { %1716 = vmatmul.mubr.msk.f32.vlgmr.msra.gmra.mxu1 %vm274_vm3, %v384_v14  ;;  %v633_v17 = vmul.f32 %v1839_v9, %v632_v15 }
 0x381   :  { %1719 = vmatpush3.msra.mxu1 %v2024_v23  ;;  %1722 = vmatprep.mubr.msk.f32.mxu1 %vm1954_vm1, %v1953_v0 }
 0x382   :  { %1720 = vmatprep.subr.mxu1 %v1953_v0  ;;  %v634_v21 = vmul.f32 %v1833_v59, %v633_v17 }
 0x383   :  { %1721 = vmatpush3.msra.mxu1 %v2018_v20 }
 0x384   :  { %1732 = vmatprep.subr.mxu1 %v1953_v0  ;;  %1723 = vmatmul.mubr.msk.f32.vlgmr.msra.gmra.mxu1 %vm274_vm3, %v288_v16 }
 0x385   :  { %1733 = vmatpush3.msra.mxu1 %v638_v13  ;;  %1736 = vmatprep.mubr.msk.f32.mxu1 %vm1954_vm1, %v1953_v0 }
 0x386   :  { %1734 = vmatprep.subr.mxu1 %v1953_v0 }
 0x387   :  { %1735 = vmatpush3.msra.mxu1 %v636_v19 }
 0x388   :  { %1739 = vmatprep.subr.mxu1 %v1953_v0  ;;  %1737 = vmatmul.mubr.msk.f32.vlgmr.msra.gmra.mxu1 %vm274_vm3, %v634_v21 }
 0x389   :  { %1740 = vmatpush3.xpose.msk.msra.mxu1 %vm196_vm2, %v720_v22  ;;  %1743 = vmatprep.mubr.msk.f32.mxu1 %vm1954_vm1, %v1953_v0 }
 0x38a   :  { %1741 = vmatprep.subr.mxu1 %v1953_v0 }
 0x38d   :  { %1742 = vmatpush3.xpose.msk.msra.mxu1 %vm196_vm2, %v718_v24 }
 0x38e   :  { %1760 = vmatprep.subr.mxu1 %v1953_v0 }
 0x390   :  { %1744 = vmatmul.mubr.msk.f32.vlgmr.msra.gmra.mxu1 %vm196_vm2, %v716_v25 }
 0x391   :  { %1761 = vmatpush3.xpose.msk.msra.mxu1 %vm196_vm2, %v994_v26  ;;  %1764 = vmatprep.mubr.msk.f32.mxu1 %vm1954_vm1, %v1953_v0 }
 0x392   :  { %1762 = vmatprep.subr.mxu1 %v1953_v0 }
 0x395   :  { %1763 = vmatpush3.xpose.msk.msra.mxu1 %vm196_vm2, %v992_v27 }
 0x396   :  { %1774 = vmatprep.subr.mxu1 %v1953_v0 }
 0x398   :  { %1765 = vmatmul.mubr.msk.f32.vlgmr.msra.gmra.mxu1 %vm196_vm2, %v990_v28 }
 0x399   :  { %1775 = vmatpush3.msra.mxu1 %v2072_v36  ;;  %1778 = vmatprep.mubr.msk.f32.mxu1 %vm1954_vm1, %v1953_v0 }
 0x39a   :  { %1776 = vmatprep.subr.mxu1 %v1953_v0 }
 0x39b   :  { %1777 = vmatpush3.msra.mxu1 %v2068_v33 }
 0x39c   :  { %1788 = vmatprep.subr.mxu1 %v1953_v0 }
 0x440   :  { %v462_v29 = vpop.f32.mrf.mxu1 }
 0x442   :  { %v1717_v30 = vpop.f32.mrf.mxu1 }
 0x444   :  { %v535_v31 = vpop.f32.mrf.mxu1 }
 0x445   :  { %v536_v32 = vadd.f32 %v535_v31, %v462_v29 }
 0x446   :  { %v1724_v35 = vpop.f32.mrf.mxu1 }
 0x448   :  { %v710_v37 = vpop.f32.mrf.mxu1 }
 0x449   :  { %v2137_v38 = vadd.f32 %v710_v37, %v536_v32 }
 0x44a   :  { %v1738_v40 = vpop.f32.mrf.mxu1 }
 0x450   :  { %v793_v41 = vpop.f32.mrf.mxu1 }
 0x451   :  { %v797_v42 = vsel %vm274_vm3, %v793_v41, -inf }
 0x452   :  { %798 = vmax.xlane.f32.xlu0 %v797_v42  ;;  %v1745_v43 = vpop.f32.mrf.mxu1 }
 0x458   :  { %v1067_v44 = vpop.f32.mrf.mxu1 }
 0x459   :  { %v1071_v45 = vsel %vm274_vm3, %v1067_v44, -inf }
 0x45a   :  { %1072 = vmax.xlane.f32.xlu1 %v1071_v45  ;;  %v1766_v46 = vpop.f32.mrf.mxu1 }
 0x46b   :  { %813 = vrot.lane.b32.xlu1 %v2024_v23, %s1963_s9 }
 0x46f   :  { %896 = vrot.lane.b32.xlu1 %v2075_v39, %s1956_s2 }
 0x473   :  { %894 = vrot.lane.b32.xlu1 %v2070_v34, %s1956_s2 }
 0x477   :  { %1087 = vrot.lane.b32.xlu1 %v2068_v33, %s1956_s2 }
 0x47b   :  { %1241 = vrot.lane.b32.xlu1 %v2070_v34, %s1957_s30 }
 0x4db   :  { %v799_v47 = vpop.xlane.xlu0 %798 }
 0x4dc   :  { %v800_v48 = vsub.f32 %v793_v41, %v799_v47 }
 0x4de   :  { %v801_v49 = vmul.f32 1.442695, %v800_v48 }
 0x4e0   :  { %1840 = vpow2.f32 %v801_v49 }
 0x4e3   :  { %v1073_v50 = vpop.xlane.xlu1 %1072 }
 0x4e4   :  { %v1074_v53 = vsub.f32 %v1067_v44, %v1073_v50 }
 0x4e6   :  { %v1075_v54 = vmul.f32 1.442695, %v1074_v53 }
 0x4e7   :  { %v814_v51 = vpop.permute.xlu1 %813 }
 0x4e8   :  { %1747 = vmatpush3.msra.mxu0 %v814_v51  ;;  %1842 = vpow2.f32 %v1075_v54 }
 0x4e9   :  { %1748 = vmatprep.subr.mxu0 %v1953_v0 }
 0x4eb   :  { %v897_v62 = vpop.permute.xlu1 %896 }
 0x4ed   :  { %v1841_v23 = vpop.eup %1840 }
 0x4ee   :  { %v803_v52 = vsel %vm274_vm3, %v1841_v23, 0.0 }
 0x4ef   :  { %804 = vadd.xlane.f32.xlu0 %v803_v52  ;;  %v895_v1 = vpop.permute.xlu1 %894 }
 0x4f3   :  { %v1088_v4 = vpop.permute.xlu1 %1087 }
 0x4f5   :  { %v1843_v55 = vpop.eup %1842 }
 0x4f6   :  { %v1077_v56 = vsel %vm274_vm3, %v1843_v55, 0.0 }
 0x4f7   :  { %v1242_v11 = vpop.permute.xlu1 %1241 }
 0x505   :  { %811 = vrot.lane.b32.xlu0 %v2018_v20, %s1963_s9 }
 0x524   :  { %1078 = vadd.xlane.f32.xlu0 %v1077_v56 }
 0x53a   :  { %1089 = vrot.lane.b32.xlu0 %v2072_v36, %s1956_s2 }
 0x53e   :  { %1243 = vrot.lane.b32.xlu0 %v2075_v39, %s1957_s30 }
 0x542   :  { %1239 = vrot.lane.b32.xlu0 %v2013_v18, %s1959_s5 }
 0x578   :  { %v805_v57 = vpop.xlane.xlu0 %804 }
 0x579   :  { %1844 = vrcp.f32 %v805_v57 }
 0x57c   :  { %v812_v58 = vpop.permute.xlu0 %811 }
 0x57d   :  { %1749 = vmatpush3.msra.mxu0 %v812_v58 }
 0x57e   :  { %1753 = vmatprep.subr.mxu0 %v1953_v0 }
 0x586   :  { %v1845_v20 = vpop.eup %1844 }
 0x587   :  { %v807_v59 = vmul.f32 %v1845_v20, %v805_v57 }
 0x589   :  { %v808_v60 = vsub.f32 2.0, %v807_v59 }
 0x58b   :  { %v809_v61 = vmul.f32 %v1845_v20, %v808_v60 }
 0x58d   :  { %v810_v63 = vmul.f32 %v1841_v23, %v809_v61 }
 0x58f   :  { %1751 = vmatmul.mubr.msk.f32.vlgmr.msra.gmra.mxu0 %vm274_vm3, %v810_v63 }
 0x590   :  { %1754 = vmatpush3.xpose.msk.msra.mxu0 %vm196_vm2, %v897_v62  ;;  %1757 = vmatprep.mubr.msk.f32.mxu0 %vm1954_vm1, %v1953_v0 }
 0x591   :  { %1755 = vmatprep.subr.mxu0 %v1953_v0 }
 0x594   :  { %1756 = vmatpush3.xpose.msk.msra.mxu0 %vm196_vm2, %v895_v1 }
 0x595   :  { %1767 = vmatprep.subr.mxu0 %v1953_v0 }
 0x597   :  { %1758 = vmatmul.mubr.msk.f32.vlgmr.msra.gmra.mxu0 %vm196_vm2, %v2013_v18 }
 0x598   :  { %1771 = vmatprep.mubr.msk.f32.mxu0 %vm1954_vm1, %v1953_v0 }
 0x5ad   :  { %v1079_v2 = vpop.xlane.xlu0 %1078 }
 0x5ae   :  { %1846 = vrcp.f32 %v1079_v2 }
 0x5b1   :  { %v1090_v3 = vpop.permute.xlu0 %1089 }
 0x5b2   :  { %1768 = vmatpush3.msra.mxu0 %v1090_v3 }
 0x5b3   :  { %1769 = vmatprep.subr.mxu0 %v1953_v0 }
 0x5b4   :  { %1770 = vmatpush3.msra.mxu0 %v1088_v4 }
 0x5b5   :  { %1781 = vmatprep.subr.mxu0 %v1953_v0  ;;  %v1244_v10 = vpop.permute.xlu0 %1243 }
 0x5b9   :  { %v1240_v12 = vpop.permute.xlu0 %1239 }
 0x5bb   :  { %v1847_v5 = vpop.eup %1846 }
 0x5bc   :  { %v1081_v6 = vmul.f32 %v1847_v5, %v1079_v2 }
 0x5be   :  { %v1082_v7 = vsub.f32 2.0, %v1081_v6 }
 0x5c0   :  { %v1083_v8 = vmul.f32 %v1847_v5, %v1082_v7 }
 0x5c2   :  { %v1084_v9 = vmul.f32 %v1843_v55, %v1083_v8 }
 0x5c4   :  { %1772 = vmatmul.mubr.msk.f32.vlgmr.msra.gmra.mxu0 %vm274_vm3, %v1084_v9 }
 0x5c5   :  { %1782 = vmatpush3.xpose.msk.msra.mxu0 %vm196_vm2, %v1244_v10  ;;  %1785 = vmatprep.mubr.msk.f32.mxu0 %vm1954_vm1, %v1953_v0 }
 0x5c6   :  { %1783 = vmatprep.subr.mxu0 %v1953_v0 }
 0x5c9   :  { %1784 = vmatpush3.xpose.msk.msra.mxu0 %vm196_vm2, %v1242_v11 }
 0x5ca   :  { %1802 = vmatprep.subr.mxu0 %v1953_v0 }
 0x5cc   :  { %1786 = vmatmul.mubr.msk.f32.vlgmr.msra.gmra.mxu0 %vm196_vm2, %v1240_v12 }
 0x5cd   :  { %1806 = vmatprep.mubr.msk.f32.mxu0 %vm1954_vm1, %v1953_v0 }
 0x64f   :  { %v886_v13 = vpop.f32.mrf.mxu0 }
 0x650   :  { %v890_v14 = vadd.f32 %v886_v13, %v2137_v38 }
 0x651   :  { %v1752_v15 = vpop.f32.mrf.mxu0 }
 0x652   :  { %891 = vst.msk [vmem:[#allocation8] sm:$0xff] %vm72_vm0, %v890_v14 }
 0x657   :  { %v971_v16 = vpop.f32.mrf.mxu0 }
 0x658   :  { %v975_v17 = vsel %vm274_vm3, %v971_v16, -inf }
 0x659   :  { %976 = vmax.xlane.f32.xlu1 %v975_v17  ;;  %v1759_v19 = vpop.f32.mrf.mxu0 }
 0x66a   :  { %1335 = vrot.lane.b32.xlu1 %v2068_v33, %s1960_s6 }
 0x684   :  { %v1162_v21 = vpop.f32.mrf.mxu0 }
 0x686   :  { %v1773_v22 = vpop.f32.mrf.mxu0 }
 0x68c   :  { %v1317_v24 = vpop.f32.mrf.mxu0 }
 0x68d   :  { %v1321_v25 = vsel %vm274_vm3, %v1317_v24, -inf }
 0x68e   :  { %1322 = vmax.xlane.f32.xlu0 %v1321_v25  ;;  %v1787_v26 = vpop.f32.mrf.mxu0 }
 0x6e2   :  { %v977_v27 = vpop.xlane.xlu1 %976 }
 0x6e3   :  { %v978_v28 = vsub.f32 %v971_v16, %v977_v27 }
 0x6e5   :  { %v979_v29 = vmul.f32 1.442695, %v978_v28 }
 0x6e6   :  { %v1336_v47 = vpop.permute.xlu1 %1335 }
 0x6e7   :  { %1848 = vpow2.f32 %v979_v29 }
 0x6f4   :  { %v1849_v30 = vpop.eup %1848 }
 0x6f5   :  { %v981_v31 = vsel %vm274_vm3, %v1849_v30, 0.0 }
 0x6f6   :  { %982 = vadd.xlane.f32.xlu0 %v981_v31 }
 0x70c   :  { %1337 = vrot.lane.b32.xlu0 %v2072_v36, %s1960_s6 }
 0x710   :  { %1417 = vrot.lane.b32.xlu0 %v2070_v34, %s1961_s7 }
 0x717   :  { %v1323_v32 = vpop.xlane.xlu0 %1322 }
 0x718   :  { %v1324_v35 = vsub.f32 %v1317_v24, %v1323_v32 }
 0x71a   :  { %v1325_v37 = vmul.f32 1.442695, %v1324_v35 }
 0x71c   :  { %1850 = vpow2.f32 %v1325_v37 }
 0x729   :  { %v1851_v38 = vpop.eup %1850 }
 0x72a   :  { %v1327_v40 = vsel %vm274_vm3, %v1851_v38, 0.0 }
 0x72b   :  { %1328 = vadd.xlane.f32.xlu1 %v1327_v40 }
 0x73c   :  { %1419 = vrot.lane.b32.xlu1 %v2075_v39, %s1961_s7 }
 0x740   :  { %1415 = vrot.lane.b32.xlu1 %v2013_v18, %s1962_s8 }
 0x77f   :  { %v983_v41 = vpop.xlane.xlu0 %982 }
 0x780   :  { %1852 = vrcp.f32 %v983_v41 }
 0x783   :  { %v1338_v46 = vpop.permute.xlu0 %1337 }
 0x787   :  { %v1418_v52 = vpop.permute.xlu0 %1417 }
 0x78d   :  { %v1853_v42 = vpop.eup %1852 }
 0x78e   :  { %v985_v43 = vmul.f32 %v1853_v42, %v983_v41 }
 0x790   :  { %v986_v44 = vsub.f32 2.0, %v985_v43 }
 0x792   :  { %v987_v34 = vmul.f32 %v1853_v42, %v986_v44 }
 0x794   :  { %v988_v45 = vmul.f32 %v1849_v30, %v987_v34 }
 0x796   :  { %1779 = vmatmul.mubr.msk.f32.vlgmr.msra.gmra.mxu1 %vm274_vm3, %v988_v45 }
 0x797   :  { %1789 = vmatpush3.msra.mxu1 %v1338_v46  ;;  %1792 = vmatprep.mubr.msk.f32.mxu1 %vm1954_vm1, %v1953_v0 }
 0x798   :  { %1790 = vmatprep.subr.mxu1 %v1953_v0 }
 0x799   :  { %1791 = vmatpush3.msra.mxu1 %v1336_v47 }
 0x79a   :  { %1795 = vmatprep.subr.mxu1 %v1953_v0 }
 0x7b4   :  { %v1329_v18 = vpop.xlane.xlu1 %1328 }
 0x7b5   :  { %1854 = vrcp.f32 %v1329_v18 }
 0x7b8   :  { %v1420_v23 = vpop.permute.xlu1 %1419 }
 0x7bc   :  { %v1416_v53 = vpop.permute.xlu1 %1415 }
 0x7c2   :  { %v1855_v39 = vpop.eup %1854 }
 0x7c3   :  { %v1331_v48 = vmul.f32 %v1855_v39, %v1329_v18 }
 0x7c5   :  { %v1332_v49 = vsub.f32 2.0, %v1331_v48 }
 0x7c7   :  { %v1333_v50 = vmul.f32 %v1855_v39, %v1332_v49 }
 0x7c9   :  { %v1334_v51 = vmul.f32 %v1851_v38, %v1333_v50 }
 0x7cb   :  { %1793 = vmatmul.mubr.msk.f32.vlgmr.msra.gmra.mxu1 %vm274_vm3, %v1334_v51 }
 0x7cc   :  { %1796 = vmatpush3.xpose.msk.msra.mxu1 %vm196_vm2, %v1420_v23  ;;  %1799 = vmatprep.mubr.msk.f32.mxu1 %vm1954_vm1, %v1953_v0 }
 0x7cd   :  { %1797 = vmatprep.subr.mxu1 %v1953_v0 }
 0x7d0   :  { %1798 = vmatpush3.xpose.msk.msra.mxu1 %vm196_vm2, %v1418_v52 }
 0x7d3   :  { %1800 = vmatmul.mubr.msk.f32.vlgmr.msra.gmra.mxu1 %vm196_vm2, %v1416_v53 }
 0x856   :  { %v1235_v54 = vpop.f32.mrf.mxu1 }
 0x857   :  { %v1236_v56 = vadd.f32 %v1235_v54, %v1162_v21 }
 0x858   :  { %v1780_v55 = vpop.f32.mrf.mxu1 }
 0x88b   :  { %v1410_v57 = vpop.f32.mrf.mxu1 }
 0x88c   :  { %v1414_v58 = vadd.f32 %v1410_v57, %v1236_v56 }
 0x88d   :  { %v1794_v20 = vpop.f32.mrf.mxu1 }
 0x893   :  { %v1493_v59 = vpop.f32.mrf.mxu1 }
 0x894   :  { %v1497_v60 = vsel %vm274_vm3, %v1493_v59, -inf }
 0x895   :  { %1498 = vmax.xlane.f32.xlu0 %v1497_v60  ;;  %v1801_v61 = vpop.f32.mrf.mxu1 }
 0x8ab   :  { %1513 = vrot.lane.b32.xlu0 %v2072_v36, %s1963_s9 }
 0x91e   :  { %v1499_v62 = vpop.xlane.xlu0 %1498 }
 0x91f   :  { %v1500_v63 = vsub.f32 %v1493_v59, %v1499_v62 }
 0x921   :  { %v1501_v1 = vmul.f32 1.442695, %v1500_v63 }
 0x922   :  { %v1514_v2 = vpop.permute.xlu0 %1513 }
 0x923   :  { %1856 = vpow2.f32 %v1501_v1  ;;  %1803 = vmatpush3.msra.mxu0 %v1514_v2 }
 0x924   :  { %1804 = vmatprep.subr.mxu0 %v1953_v0 }
 0x930   :  { %v1857_v3 = vpop.eup %1856 }
 0x931   :  { %v1503_v4 = vsel %vm274_vm3, %v1857_v3, 0.0 }
 0x932   :  { %1504 = vadd.xlane.f32.xlu1 %v1503_v4 }
 0x943   :  { %1511 = vrot.lane.b32.xlu1 %v2068_v33, %s1963_s9 }
 0x9bb   :  { %v1505_v5 = vpop.xlane.xlu1 %1504 }
 0x9bc   :  { %1858 = vrcp.f32 %v1505_v5 }
 0x9bf   :  { %v1512_v6 = vpop.permute.xlu1 %1511 }
 0x9c0   :  { %1805 = vmatpush3.msra.mxu0 %v1512_v6 }
 0x9c9   :  { %v1859_v36 = vpop.eup %1858 }
 0x9ca   :  { %v1507_v7 = vmul.f32 %v1859_v36, %v1505_v5 }
 0x9cc   :  { %v1508_v8 = vsub.f32 2.0, %v1507_v7 }
 0x9ce   :  { %v1509_v9 = vmul.f32 %v1859_v36, %v1508_v8 }
 0x9d0   :  { %v1510_v10 = vmul.f32 %v1857_v3, %v1509_v9 }
 0x9d2   :  { %1807 = vmatmul.mubr.msk.f32.vlgmr.msra.gmra.mxu0 %vm274_vm3, %v1510_v10 }
 0xa92   :  { %v1586_v0 = vpop.f32.mrf.mxu0 }
 0xa93   :  { %v1590_v11 = vadd.f32 %v1586_v0, %v1414_v58 }
 0xa94   :  { %v1808_v12 = vpop.f32.mrf.mxu0 }
 0xa95   :  { %1592 = vst.msk [vmem:[#allocation8 + $0x8] sm:$0xff] %vm72_vm0, %v1590_v11 }
 0xa96   :  { %1931 = shalt.err (!%p1928_p5)
}
 0xa97   :  { %1604 = dma.vmem_to_hbm [thread:$0]  %s1599_s11, 256, %s2232_s3, [#allocation4], %s1948_s17, %s1948_s17, %s1949_s18  }
 0xa98   :  { %1944 = dma.done.wait [#allocation4], 256  }
 0xa99   :  { %1945 = vsyncadd [#allocation4], 4294967040 }
 0xa9a   :  { %1608 = vsyncpa [#allocation3], 1 }
 0xa9b   :  { %1609 = vsyncpa [#allocation6], 1 }
 0xa9c   :  { %1610 = vsyncpa [#allocation4], 1 }

</bundles_post_ra>
